<compile_context>
chip_gen: v7x
topology: tpu7x:2x2x1
jax: 0.10.0
libtpu: 0.0.40
codegen_flags: <defaults>
</compile_context>

<pallas_src>
import jax
import jax.numpy as jnp
from jax.experimental import pallas as pl
from jax.experimental.pallas import tpu as pltpu


def _round_up(x, m):
    return ((x + m - 1) // m) * m


def cemnet_kernel(x_ref, w1_ref, b1_ref, w2_ref, b2_ref, out_ref):
    # x:  [tm, obs_p]        w1: [obs_p, hid_p]   b1: [1, hid_p]
    # w2: [hid_p, act_p]     b2: [1, act_p]       out: [tm, act_p]
    x = x_ref[...]
    h = jnp.dot(x, w1_ref[...], preferred_element_type=jnp.float32) + b1_ref[...]
    h = jnp.maximum(h, 0.0)                      # ReLU on the VPU
    y = jnp.dot(h, w2_ref[...], preferred_element_type=jnp.float32) + b2_ref[...]
    out_ref[...] = y.astype(out_ref.dtype)       # lane-dense (act_p = multiple of 128)


def cemnet_forward(x, w1, b1, w2, b2, *, tm_max=256):
    batch, obs = x.shape
    hidden = w1.shape[1]
    n_actions = w2.shape[1]

    # Pad feature dims to TPU-friendly sizes (zeros are exact no-ops here).
    obs_p = _round_up(obs, 8)            # sublane-aligned contraction dim
    hid_p = _round_up(hidden, 128)       # lane-full hidden activation
    act_p = _round_up(n_actions, 128)    # lane-dense output stores
    tm = min(tm_max, _round_up(batch, 8))
    b_p = _round_up(batch, tm)

    f32 = jnp.float32
    x_p = jnp.zeros((b_p, obs_p), f32).at[:batch, :obs].set(x.astype(f32))
    w1_p = jnp.zeros((obs_p, hid_p), f32).at[:obs, :hidden].set(w1.astype(f32))
    b1_p = jnp.zeros((1, hid_p), f32).at[:, :hidden].set(b1.astype(f32))
    w2_p = jnp.zeros((hid_p, act_p), f32).at[:hidden, :n_actions].set(w2.astype(f32))
    b2_p = jnp.zeros((1, act_p), f32).at[:, :n_actions].set(b2.astype(f32))

    grid = (b_p // tm,)

    cost = pl.CostEstimate(
        flops=2 * b_p * (obs_p * hid_p + hid_p * act_p),
        transcendentals=0,
        bytes_accessed=4 * (b_p * obs_p + obs_p * hid_p + hid_p
                            + hid_p * act_p + act_p + b_p * act_p),
    )

    out_padded = pl.pallas_call(
        cemnet_kernel,
        out_shape=jax.ShapeDtypeStruct((b_p, act_p), f32),
        grid=grid,
        in_specs=[
            pl.BlockSpec((tm, obs_p), lambda i: (i, 0)),      # batch-tiled activations
            pl.BlockSpec((obs_p, hid_p), lambda i: (0, 0)),   # weights pinned in VMEM
            pl.BlockSpec((1, hid_p), lambda i: (0, 0)),
            pl.BlockSpec((hid_p, act_p), lambda i: (0, 0)),
            pl.BlockSpec((1, act_p), lambda i: (0, 0)),
        ],
        out_specs=pl.BlockSpec((tm, act_p), lambda i: (i, 0)),
        compiler_params=pltpu.CompilerParams(
            dimension_semantics=("parallel",),        # shard batch grid across TCs (v7x)
            vmem_limit_bytes=16 * 1024 * 1024,        # tiny footprint; safe on 64 MiB v7x
        ),
        cost_estimate=cost,
    )(x_p, w1_p, b1_p, w2_p, b2_p)

    # Slice padding away in the wrapper (keeps kernel stores lane-dense).
    return out_padded[:batch, :n_actions]


def init_params(key, obs_size, hidden_size, n_actions):
    # Deterministic synthetic init (PyTorch-like uniform fan-in bounds).
    k1, k2, k3, k4 = jax.random.split(key, 4)
    bound1 = 1.0 / jnp.sqrt(obs_size)
    bound2 = 1.0 / jnp.sqrt(hidden_size)
    w1 = jax.random.uniform(k1, (obs_size, hidden_size), jnp.float32, -bound1, bound1)
    b1 = jax.random.uniform(k2, (1, hidden_size), jnp.float32, -bound1, bound1)
    w2 = jax.random.uniform(k3, (hidden_size, n_actions), jnp.float32, -bound2, bound2)
    b2 = jax.random.uniform(k4, (1, n_actions), jnp.float32, -bound2, bound2)
    return w1, b1, w2, b2


if __name__ == "__main__":
    # CEM-population-sized batch (amortizes per-call overhead), tiny policy net.
    batch, obs_size, hidden_size, n_actions = 512, 4, 32, 2

    key = jax.random.PRNGKey(0)
    kx, kp = jax.random.split(key)
    x = jax.random.normal(kx, (batch, obs_size), dtype=jnp.float32)
    w1, b1, w2, b2 = init_params(kp, obs_size, hidden_size, n_actions)

    out = cemnet_forward(x, w1, b1, w2, b2)
    out = jax.block_until_ready(out)

    # Pure-JAX reference check of the same (unpadded) forward pass.
    ref = jnp.maximum(x @ w1 + b1, 0.0) @ w2 + b2
    assert out.shape == (batch, n_actions)
    assert jnp.allclose(out, ref, atol=1e-4, rtol=1e-4)

    print("KERNEL_OK")
</pallas_src>

<mosaic_0001>
module attributes {stable_mosaic.version = 11 : i64} {
  func.func @cemnet_kernel(%arg0: i32, %arg1: memref<256x8xf32, #tpu.memory_space<vmem>>, %arg2: memref<8x128xf32, #tpu.memory_space<vmem>>, %arg3: memref<1x128xf32, #tpu.memory_space<vmem>>, %arg4: memref<128x128xf32, #tpu.memory_space<vmem>>, %arg5: memref<1x128xf32, #tpu.memory_space<vmem>>, %arg6: memref<256x128xf32, #tpu.memory_space<vmem>>) attributes {dimension_semantics = [#tpu.dimension_semantics<parallel>], iteration_bounds = array<i64: 2>, scalar_prefetch = 0 : i64, scratch_operands = 0 : i64, tpu.core_type = #tpu.core_type<tc>, window_params = [{transform_indices = @transform_0, window_bounds = array<i64: 256, 8>}, {pipeline_mode = #tpu.pipeline_mode<synchronous>, transform_indices = @transform_1, window_bounds = array<i64: 8, 128>}, {pipeline_mode = #tpu.pipeline_mode<synchronous>, transform_indices = @transform_2, window_bounds = array<i64: 1, 128>}, {pipeline_mode = #tpu.pipeline_mode<synchronous>, transform_indices = @transform_3, window_bounds = array<i64: 128, 128>}, {pipeline_mode = #tpu.pipeline_mode<synchronous>, transform_indices = @transform_4, window_bounds = array<i64: 1, 128>}, {transform_indices = @transform_5, window_bounds = array<i64: 256, 128>}]} {
    %c0 = arith.constant 0 : index
    %c0_0 = arith.constant 0 : index
    %0 = vector.load %arg1[%c0, %c0_0] : memref<256x8xf32, #tpu.memory_space<vmem>>, vector<256x8xf32>
    %c0_1 = arith.constant 0 : index
    %c0_2 = arith.constant 0 : index
    %1 = vector.load %arg2[%c0_1, %c0_2] : memref<8x128xf32, #tpu.memory_space<vmem>>, vector<8x128xf32>
    %cst = arith.constant dense<0.000000e+00> : vector<256x128xf32>
    %2 = tpu.matmul %0, %1, %cst {dimension_numbers = #tpu.dot_dimension_numbers<[1], [0], [0], [1], [0, 0, 1, 1], [], []>} : vector<256x8xf32>, vector<8x128xf32>, vector<256x128xf32> -> vector<256x128xf32>
    %c0_3 = arith.constant 0 : index
    %c0_4 = arith.constant 0 : index
    %3 = vector.load %arg3[%c0_3, %c0_4] : memref<1x128xf32, #tpu.memory_space<vmem>>, vector<1x128xf32>
    %4 = vector.broadcast %3 : vector<1x128xf32> to vector<256x128xf32>
    %5 = arith.addf %2, %4 : vector<256x128xf32>
    %cst_5 = arith.constant 0.000000e+00 : f32
    %6 = vector.broadcast %cst_5 : f32 to vector<256x128xf32>
    %7 = arith.maximumf %5, %6 : vector<256x128xf32>
    %c0_6 = arith.constant 0 : index
    %c0_7 = arith.constant 0 : index
    %8 = vector.load %arg4[%c0_6, %c0_7] : memref<128x128xf32, #tpu.memory_space<vmem>>, vector<128x128xf32>
    %cst_8 = arith.constant dense<0.000000e+00> : vector<256x128xf32>
    %9 = tpu.matmul %7, %8, %cst_8 {dimension_numbers = #tpu.dot_dimension_numbers<[1], [0], [0], [1], [0, 0, 1, 1], [], []>} : vector<256x128xf32>, vector<128x128xf32>, vector<256x128xf32> -> vector<256x128xf32>
    %c0_9 = arith.constant 0 : index
    %c0_10 = arith.constant 0 : index
    %10 = vector.load %arg5[%c0_9, %c0_10] : memref<1x128xf32, #tpu.memory_space<vmem>>, vector<1x128xf32>
    %11 = vector.broadcast %10 : vector<1x128xf32> to vector<256x128xf32>
    %12 = arith.addf %9, %11 : vector<256x128xf32>
    %c0_11 = arith.constant 0 : index
    %c0_12 = arith.constant 0 : index
    %13 = vector.load %arg6[%c0_11, %c0_12] : memref<256x128xf32, #tpu.memory_space<vmem>>, vector<256x128xf32>
    tpu.vector_store %arg6[%c0_11, %c0_12], %12 {strides = array<i32>} : memref<256x128xf32, #tpu.memory_space<vmem>>, vector<256x128xf32>,
    return
  }
  func.func @transform_0(%arg0: i32) -> (i32, i32) {
    %c0_i32 = arith.constant 0 : i32
    %c0_i32_0 = arith.constant 0 : i32
    return %arg0, %c0_i32 : i32, i32
  }
  func.func @transform_1(%arg0: i32) -> (i32, i32) {
    %c0_i32 = arith.constant 0 : i32
    %c0_i32_0 = arith.constant 0 : i32
    %c0_i32_1 = arith.constant 0 : i32
    return %c0_i32, %c0_i32_0 : i32, i32
  }
  func.func @transform_2(%arg0: i32) -> (i32, i32) {
    %c0_i32 = arith.constant 0 : i32
    %c0_i32_0 = arith.constant 0 : i32
    %c0_i32_1 = arith.constant 0 : i32
    return %c0_i32, %c0_i32_0 : i32, i32
  }
  func.func @transform_3(%arg0: i32) -> (i32, i32) {
    %c0_i32 = arith.constant 0 : i32
    %c0_i32_0 = arith.constant 0 : i32
    %c0_i32_1 = arith.constant 0 : i32
    return %c0_i32, %c0_i32_0 : i32, i32
  }
  func.func @transform_4(%arg0: i32) -> (i32, i32) {
    %c0_i32 = arith.constant 0 : i32
    %c0_i32_0 = arith.constant 0 : i32
    %c0_i32_1 = arith.constant 0 : i32
    return %c0_i32, %c0_i32_0 : i32, i32
  }
  func.func @transform_5(%arg0: i32) -> (i32, i32) {
    %c0_i32 = arith.constant 0 : i32
    %c0_i32_0 = arith.constant 0 : i32
    return %arg0, %c0_i32 : i32, i32
  }
}

</mosaic_0001>

<bundles_post_ra>
// kernel: tpu_custom_call.1
= control target key start
LH: loop header
LB: loop body
LE: loop exit
PB: predicated region body
PF: predicated region fallthrough
CT: control target
= control target key end

     0   :  { %10 = vsyncpa [#allocation3], 0  ;;  %s1752_s0 = inlined_call_operand.vmem [shape: f32[512,8], index: 0, kind: input, shape index: {}]   ;;  %s1753_s1 = inlined_call_operand.vmem [shape: f32[8,128], index: 1, kind: input, shape index: {}]   ;;  %s1754_s2 = inlined_call_operand.vmem [shape: f32[1,128], index: 2, kind: input, shape index: {}]   ;;  %s1755_s3 = inlined_call_operand.vmem [shape: f32[128,128], index: 3, kind: input, shape index: {}]   ;;  %s1756_s4 = inlined_call_operand.vmem [shape: f32[1,128], index: 4, kind: input, shape index: {}]   ;;  %s1757_s5 = inlined_call_operand.hbm [shape: f32[512,128], index: 5, kind: output, shape index: {}]  }
   0x1   :  { %12 = vsyncpa [#allocation3 + $0x1], 0  ;;  %s1420_s18 = smov 0   ;;  %s1422_s19 = smov 0  }
   0x2   :  { %s1424_s20 = smov 0   ;;  %s1426_s21 = smov 0  }
   0x3 LB: > { %s1441_s22 = sadd.s32 4294967295, %s1385_s21   ;;  %s976_s23 = sadd.s32 4294967294, %s1385_s21   ;;  %s1385_s21 = sphi %s1426_s21, %s1763_s21   ;;  %s1381_s20 = sphi %s1424_s20, %s1762_s20   ;;  %s1377_s19 = sphi %s1422_s19, %s1761_s19   ;;  %s1373_s18 = sphi %s1420_s18, %s1760_s18  }
   0x4   : > { %s1445_s24 = sadd.s32 1, %s1385_s21   ;;  %s135_s25 = sadd.s32 1, %s1381_s20 }
   0x5   : > { %s132_s26 = ssub.s32 %s1385_s21, %s1445_s24  ;;  %p145_p0 = scmp.ne.s32.totalorder %s1381_s20, %s1377_s19 }
   0x6   : > { %p133_p1 = scmp.eq.s32.totalorder %s132_s26, 0  ;;  %p146_p2 = scmp.eq.s32.totalorder %s1441_s22, 1 }
   0x7   : > { %p151_p3 = scmp.ne.s32.totalorder %s1377_s19, %s1373_s18  ;;  %p152_p4 = scmp.eq.s32.totalorder %s976_s23, 1 }
   0x8   : > { %s1456_s27 = scalar_select %p133_p1, %s1381_s20, %s135_s25  }
   0x9   : > { %p1458_p5 = por %p146_p2, %p145_p0  ;;  %p1462_p6 = por %p152_p4, %p151_p3 }
   0xa   : > { %p979_p7 = scmp.ge.s32.totalorder %s1385_s21, 1  ;;  %p191_p8 = scmp.lt.s32.totalorder %s1385_s21, 3 }
   0xc   : > { %p192_p9 = pnand %p979_p7, %p191_p8 }
   0xd   : > { %v258_v0 = vld [vmem:[%s1753_s1] sm:$0xff] (!%p192_p9)  ;;  %s981_s7 = sshll.u32 (!%p192_p9), %s1441_s22, 5  ;;  %v621_v2 = vld [vmem:[%s1755_s3 + $0x8] sm:$0xff] (!%p192_p9)  ;;  %v622_v4 = vld [vmem:[%s1755_s3 + $0x10] sm:$0xff] (!%p192_p9)  ;;  %vm266_vm0 = vcmask (!%p192_p9), 64512   ;;  %s1022_s25 = sshll.u32 (!%p192_p9), %s1441_s22, 12 }
   0xe   : > { %195 = sbr.rel (%p192_p9) target bundleno = 534 (0x216), region = 40  ;;  %v620_v1 = vld [vmem:[%s1755_s3] sm:$0xff] (!%p192_p9)  ;;  %1104 = vmatprep.subr.mxu0 (!%p192_p9), %v258_v0  ;;  %p220_p10 = scmp.lt.s32.totalorder (!%p192_p9), %s981_s7, 63  ;;  %v623_v5 = vld [vmem:[%s1755_s3 + $0x18] sm:$0xff] (!%p192_p9)  ;;  %v625_v8 = vld [vmem:[%s1755_s3 + $0x28] sm:$0xff] (!%p192_p9) }
   0xf   : > { %v1234_v3 = vpack.c.bf16 (!%p192_p9), %v621_v2, %v620_v1  ;;  %1105 = vmatpush3.msra.mxu0 (!%p192_p9), %v258_v0  ;;  %v1238_v6 = vpack.c.bf16 (!%p192_p9), %v623_v5, %v622_v4  ;;  %v624_v7 = vld [vmem:[%s1755_s3 + $0x20] sm:$0xff] (!%p192_p9)  ;;  %v626_v13 = vld [vmem:[%s1755_s3 + $0x30] sm:$0xff] (!%p192_p9)  ;;  %v627_v14 = vld [vmem:[%s1755_s3 + $0x38] sm:$0xff] (!%p192_p9)  ;;  %s1702_s9 = scalar_lea.hbm (!%p192_p9), %s1757_s5, %s1022_s25  ;;  %s1387_s10 = smov (!%p192_p9), [#allocation2]  }
  0x10   : > { %v1242_v12 = vpack.c.bf16 (!%p192_p9), %v625_v8, %v624_v7  ;;  %v1246_v17 = vpack.c.bf16 (!%p192_p9), %v627_v14, %v626_v13  ;;  %v628_v18 = vld [vmem:[%s1755_s3 + $0x40] sm:$0xff] (!%p192_p9)  ;;  %v629_v19 = vld [vmem:[%s1755_s3 + $0x48] sm:$0xff] (!%p192_p9)  ;;  %v630_v23 = vld [vmem:[%s1755_s3 + $0x50] sm:$0xff] (!%p192_p9)  ;;  %s1327_s11 = sshll.u32 (!%p192_p9), %s1387_s10, 4  ;;  %s1328_s11 = int_to_ptr.vmem [resolvable:$false] %s1327_s11 }
  0x11   : > { %1235 = vmatprep.subr.bf16.mxu0 (!%p192_p9), %v1234_v3  ;;  %1266 = vmatprep.subr.bf16.mxu1 (!%p192_p9), %v1234_v3  ;;  %v1250_v22 = vpack.c.bf16 (!%p192_p9), %v629_v19, %v628_v18  ;;  %v631_v24 = vld [vmem:[%s1755_s3 + $0x58] sm:$0xff] (!%p192_p9)  ;;  %v632_v28 = vld [vmem:[%s1755_s3 + $0x60] sm:$0xff] (!%p192_p9)  ;;  %v633_v29 = vld [vmem:[%s1755_s3 + $0x68] sm:$0xff] (!%p192_p9)  ;;  %s1329_s12 = scalar_lea.vmem (!%p192_p9), %s1328_s11, 8192 }
  0x12   : > { %1274 = vmatpush3.bf16.msra.mxu1 (!%p192_p9), %v1234_v3  ;;  %v1254_v27 = vpack.c.bf16 (!%p192_p9), %v631_v24, %v630_v23  ;;  %v1258_v32 = vpack.c.bf16 (!%p192_p9), %v633_v29, %v632_v28  ;;  %v634_v54 = vld [vmem:[%s1755_s3 + $0x70] sm:$0xff] (!%p192_p9)  ;;  %v635_v55 = vld [vmem:[%s1755_s3 + $0x78] sm:$0xff] (!%p192_p9)  ;;  %v1592_v57 = vld [vmem:[%s1754_s2] ss:$0 sm:$0xff] (!%p192_p9) }
  0x13   : > { %1267 = vmatprep.subr.bf16.mxu1 (!%p192_p9), %v1238_v6  ;;  %v1262_v56 = vpack.c.bf16 (!%p192_p9), %v635_v55, %v634_v54 }
  0x15   : > { %s1765_s7 = smov (!%p220_p10, %s981_s7), 63 }
  0x16   : > { %s982_s26 = sshll.u32 %s1765_s7, 3  ;;  %1275 = vmatpush3.bf16.msra.mxu1 %v1238_v6 }
  0x17   : > { %s1493_s8 = scalar_lea.vmem %s1752_s0, %s982_s26  ;;  %1268 = vmatprep.subr.bf16.mxu1 %v1242_v12 }
  0x18   : > { %v226_v9 = vld [vmem:[%s1493_s8] sm:$0xff]  ;;  %v227_v10 = vld [vmem:[%s1493_s8 + $0x8] sm:$0xff]  ;;  %v228_v11 = vld [vmem:[%s1493_s8 + $0x10] sm:$0xff] }
  0x19   : > { %1106 = vmatprep.mubr.msk.f32.mxu0 %vm266_vm0, %v226_v9  ;;  %v229_v15 = vld [vmem:[%s1493_s8 + $0x18] sm:$0xff]  ;;  %v230_v16 = vld [vmem:[%s1493_s8 + $0x20] sm:$0xff]  ;;  %v231_v20 = vld [vmem:[%s1493_s8 + $0x28] sm:$0xff] }
  0x1a   : > { %1107 = vmatmul.mubr.msk.f32.vlgmr.msra.gmra.mrb[0].mxu0 %vm266_vm0, %v227_v10  ;;  %1276 = vmatpush3.bf16.msra.mxu1 %v1242_v12  ;;  %v232_v21 = vld [vmem:[%s1493_s8 + $0x30] sm:$0xff]  ;;  %v233_v25 = vld [vmem:[%s1493_s8 + $0x38] sm:$0xff]  ;;  %v234_v26 = vld [vmem:[%s1493_s8 + $0x40] sm:$0xff] }
  0x1b   : > { %1109 = vmatprep.mubr.msk.f32.mxu0 %vm266_vm0, %v228_v11  ;;  %1237 = vmatpush3.bf16.msra.mxu0 %v1234_v3  ;;  %v235_v30 = vld [vmem:[%s1493_s8 + $0x48] sm:$0xff]  ;;  %v236_v31 = vld [vmem:[%s1493_s8 + $0x50] sm:$0xff]  ;;  %v237_v33 = vld [vmem:[%s1493_s8 + $0x58] sm:$0xff] }
  0x1c   : > { %1239 = vmatprep.subr.bf16.mxu0 %v1238_v6  ;;  %1269 = vmatprep.subr.bf16.mxu1 %v1246_v17  ;;  %v238_v34 = vld [vmem:[%s1493_s8 + $0x60] sm:$0xff]  ;;  %v239_v35 = vld [vmem:[%s1493_s8 + $0x68] sm:$0xff]  ;;  %v240_v36 = vld [vmem:[%s1493_s8 + $0x70] sm:$0xff] }
  0x1d   : > { %v241_v37 = vld [vmem:[%s1493_s8 + $0x78] sm:$0xff]  ;;  %v242_v38 = vld [vmem:[%s1493_s8 + $0x80] sm:$0xff]  ;;  %v243_v39 = vld [vmem:[%s1493_s8 + $0x88] sm:$0xff] }
  0x1e   : > { %1110 = vmatmul.mubr.msk.f32.gmra.mrb[2].mxu0 %vm266_vm0, %v229_v15  ;;  %1277 = vmatpush3.bf16.msra.mxu1 %v1246_v17  ;;  %v244_v40 = vld [vmem:[%s1493_s8 + $0x90] sm:$0xff]  ;;  %v245_v41 = vld [vmem:[%s1493_s8 + $0x98] sm:$0xff]  ;;  %v246_v42 = vld [vmem:[%s1493_s8 + $0xa0] sm:$0xff] }
  0x1f   : > { %1112 = vmatprep.mubr.msk.f32.mxu0 %vm266_vm0, %v230_v16  ;;  %1241 = vmatpush3.bf16.msra.mxu0 %v1238_v6  ;;  %v247_v43 = vld [vmem:[%s1493_s8 + $0xa8] sm:$0xff]  ;;  %v248_v44 = vld [vmem:[%s1493_s8 + $0xb0] sm:$0xff]  ;;  %v249_v45 = vld [vmem:[%s1493_s8 + $0xb8] sm:$0xff] }
  0x20   : > { %1243 = vmatprep.subr.bf16.mxu0 %v1242_v12  ;;  %1270 = vmatprep.subr.bf16.mxu1 %v1250_v22  ;;  %v250_v46 = vld [vmem:[%s1493_s8 + $0xc0] sm:$0xff]  ;;  %v251_v47 = vld [vmem:[%s1493_s8 + $0xc8] sm:$0xff]  ;;  %v252_v48 = vld [vmem:[%s1493_s8 + $0xd0] sm:$0xff] }
  0x21   : > { %v253_v49 = vld [vmem:[%s1493_s8 + $0xd8] sm:$0xff]  ;;  %v254_v50 = vld [vmem:[%s1493_s8 + $0xe0] sm:$0xff]  ;;  %v255_v51 = vld [vmem:[%s1493_s8 + $0xe8] sm:$0xff] }
  0x22   : > { %1113 = vmatmul.mubr.msk.f32.gmra.mrb[4].mxu0 %vm266_vm0, %v231_v20  ;;  %1278 = vmatpush3.bf16.msra.mxu1 %v1250_v22  ;;  %v256_v52 = vld [vmem:[%s1493_s8 + $0xf0] sm:$0xff]  ;;  %v257_v53 = vld [vmem:[%s1493_s8 + $0xf8] sm:$0xff]  ;;  %s216_s8 = sand.u32 1, %s1377_s19  }
  0x23   : > { %1115 = vmatprep.mubr.msk.f32.mxu0 %vm266_vm0, %v232_v21  ;;  %1245 = vmatpush3.bf16.msra.mxu0 %v1242_v12  ;;  %s980_s15 = sshll.u32 %s216_s8, 8  ;;  %s1711_s22 = scalar_lea.sflag [#allocation3], %s216_s8 }
  0x24   : > { %1247 = vmatprep.subr.bf16.mxu0 %v1246_v17  ;;  %1271 = vmatprep.subr.bf16.mxu1 %v1254_v27  ;;  %s1636_s23 = scalar_lea.vmem [#allocation2], %s980_s15 }
  0x25   : > { %s914_s26 = sshll.u32 %s1636_s23, 4  ;;  %s1704_s26 = int_to_ptr.vmem [resolvable:$true] %s914_s26 }
  0x26   : > { %1116 = vmatmul.mubr.msk.f32.gmra.mrb[6].mxu0 %vm266_vm0, %v233_v25  ;;  %1279 = vmatpush3.bf16.msra.mxu1 %v1254_v27  ;;  %s1323_s7 = scalar_lea.vmem %s1704_s26, 4096  ;;  %p1330_p0 = scmp.lt.s32.totalorder %s1704_s26, %s1328_s11 }
  0x27   : > { %1118 = vmatprep.mubr.msk.f32.mxu0 %vm266_vm0, %v234_v26  ;;  %1249 = vmatpush3.bf16.msra.mxu0 %v1246_v17  ;;  %p1324_p11 = scmp.ne.s32.totalorder %s1704_s26, %s1323_s7  ;;  %p1331_p1 = scmp.lt.s32.totalorder %s1329_s12, %s1323_s7 }
  0x28   : > { %1251 = vmatprep.subr.bf16.mxu0 %v1250_v22  ;;  %1272 = vmatprep.subr.bf16.mxu1 %v1258_v32 }
  0x29   : > { %p1325_p12 = pnand %p1324_p11, %p1458_p5  ;;  %p1332_p2 = por %p1331_p1, %p1330_p0 }
  0x2a   : > { %1119 = vmatmul.mubr.msk.f32.gmra.mrb[8].mxu0 %vm266_vm0, %v235_v30  ;;  %1280 = vmatpush3.bf16.msra.mxu1 %v1258_v32 }
  0x2b   : > { %1121 = vmatprep.mubr.msk.f32.mxu0 %vm266_vm0, %v236_v31  ;;  %1253 = vmatpush3.bf16.msra.mxu0 %v1250_v22  ;;  %p1326_p13 = pneg %p1325_p12 }
  0x2c   : > { %1255 = vmatprep.subr.bf16.mxu0 %v1254_v27  ;;  %1273 = vmatprep.subr.bf16.mxu1 %v1262_v56 }
  0x2d   : > { %p1333_p3 = pnand %p1332_p2, %p1326_p13 }
  0x2e   : > { %1122 = vmatmul.mubr.msk.f32.gmra.mrb[10].mxu0 %vm266_vm0, %v237_v33  ;;  %1281 = vmatpush3.bf16.msra.mxu1 %v1262_v56 }
  0x2f   : > { %1124 = vmatprep.mubr.msk.f32.mxu0 %vm266_vm0, %v238_v34  ;;  %1257 = vmatpush3.bf16.msra.mxu0 %v1254_v27 }
  0x30   : > { %1259 = vmatprep.subr.bf16.mxu0 %v1258_v32 }
  0x32   : > { %1125 = vmatmul.mubr.msk.f32.gmra.mrb[12].mxu0 %vm266_vm0, %v239_v35 }
  0x33   : > { %1127 = vmatprep.mubr.msk.f32.mxu0 %vm266_vm0, %v240_v36  ;;  %1261 = vmatpush3.bf16.msra.mxu0 %v1258_v32 }
  0x34   : > { %1263 = vmatprep.subr.bf16.mxu0 %v1262_v56 }
  0x36   : > { %1128 = vmatmul.mubr.msk.f32.gmra.mrb[14].mxu0 %vm266_vm0, %v241_v37 }
  0x37   : > { %1130 = vmatprep.mubr.msk.f32.mxu0 %vm266_vm0, %v242_v38  ;;  %1265 = vmatpush3.bf16.msra.mxu0 %v1262_v56 }
  0x3a   : > { %1131 = vmatmul.mubr.msk.f32.gmra.mrb[16].mxu0 %vm266_vm0, %v243_v39 }
  0x3b   : > { %1133 = vmatprep.mubr.msk.f32.mxu0 %vm266_vm0, %v244_v40 }
  0x3e   : > { %1134 = vmatmul.mubr.msk.f32.gmra.mrb[18].mxu0 %vm266_vm0, %v245_v41 }
  0x3f   : > { %1136 = vmatprep.mubr.msk.f32.mxu0 %vm266_vm0, %v246_v42 }
  0x42   : > { %1137 = vmatmul.mubr.msk.f32.gmra.mrb[20].mxu0 %vm266_vm0, %v247_v43 }
  0x43   : > { %1139 = vmatprep.mubr.msk.f32.mxu0 %vm266_vm0, %v248_v44 }
  0x46   : > { %1140 = vmatmul.mubr.msk.f32.gmra.mrb[22].mxu0 %vm266_vm0, %v249_v45 }
  0x47   : > { %1142 = vmatprep.mubr.msk.f32.mxu0 %vm266_vm0, %v250_v46 }
  0x4a   : > { %1143 = vmatmul.mubr.msk.f32.gmra.mrb[24].mxu0 %vm266_vm0, %v251_v47 }
  0x4b   : > { %1145 = vmatprep.mubr.msk.f32.mxu0 %vm266_vm0, %v252_v48 }
  0x4e   : > { %1146 = vmatmul.mubr.msk.f32.gmra.mrb[26].mxu0 %vm266_vm0, %v253_v49 }
  0x4f   : > { %1148 = vmatprep.mubr.msk.f32.mxu0 %vm266_vm0, %v254_v50 }
  0x52   : > { %1149 = vmatmul.mubr.msk.f32.gmra.mrb[28].mxu0 %vm266_vm0, %v255_v51 }
  0x53   : > { %1151 = vmatprep.mubr.msk.f32.mxu0 %vm266_vm0, %v256_v52 }
  0x56   : > { %1152 = vmatmul.mubr.msk.f32.gmra.mrb[30].mxu0 %vm266_vm0, %v257_v53 }
  0xed   : > { %v1108_v58 = vpop.f32.mrb[0].mxu0 }
  0xee   : > { %v435_v59 = vadd.f32 %v1108_v58, %v1592_v57  ;;  %v429_v60 = vpop.f32.mrb[1].mxu0 }
  0xef   : > { %v430_v61 = vadd.f32 %v1592_v57, %v429_v60 }
  0xf0   : > { %v589_v0 = vmax.f32 %v435_v59, 0.0 }
  0xf1   : > { %v588_v62 = vmax.f32 %v430_v61, 0.0  ;;  %v1111_v63 = vpop.f32.mrb[2].mxu0 }
  0xf2   : > { %v445_v1 = vadd.f32 %v1111_v63, %v1592_v57  ;;  %v439_v2 = vpop.f32.mrb[3].mxu0 }
  0xf3   : > { %v440_v3 = vadd.f32 %v1592_v57, %v439_v2  ;;  %1186 = vmatprep.mubr.f32.mxu0 %v588_v62 }
  0xf4   : > { %1187 = vmatmul.mubr.f32.vlgmr.msra.gmra.mrb[32].mxu0 %v589_v0  ;;  %v591_v6 = vmax.f32 %v445_v1, 0.0 }
  0xf5   : > { %v590_v4 = vmax.f32 %v440_v3, 0.0  ;;  %v1114_v5 = vpop.f32.mrb[4].mxu0 }
  0xf6   : > { %v455_v7 = vadd.f32 %v1114_v5, %v1592_v57  ;;  %v449_v8 = vpop.f32.mrb[5].mxu0 }
  0xf7   : > { %v450_v9 = vadd.f32 %v1592_v57, %v449_v8  ;;  %1189 = vmatprep.mubr.f32.mxu0 %v590_v4 }
  0xf8   : > { %1190 = vmatmul.mubr.f32.gmra.mrb[34].mxu0 %v591_v6  ;;  %v593_v12 = vmax.f32 %v455_v7, 0.0 }
  0xf9   : > { %v592_v10 = vmax.f32 %v450_v9, 0.0  ;;  %v1117_v11 = vpop.f32.mrb[6].mxu0 }
  0xfa   : > { %v465_v13 = vadd.f32 %v1117_v11, %v1592_v57  ;;  %v459_v14 = vpop.f32.mrb[7].mxu0 }
  0xfb   : > { %1192 = vmatprep.mubr.f32.mxu0 %v592_v10  ;;  %v460_v15 = vadd.f32 %v1592_v57, %v459_v14 }
  0xfc   : > { %1193 = vmatmul.mubr.f32.gmra.mrb[36].mxu0 %v593_v12  ;;  %v595_v18 = vmax.f32 %v465_v13, 0.0 }
  0xfd   : > { %v1120_v16 = vpop.f32.mrb[8].mxu0  ;;  %v594_v17 = vmax.f32 %v460_v15, 0.0 }
  0xfe   : > { %v475_v19 = vadd.f32 %v1120_v16, %v1592_v57  ;;  %v469_v20 = vpop.f32.mrb[9].mxu0 }
  0xff   : > { %v470_v21 = vadd.f32 %v1592_v57, %v469_v20  ;;  %1195 = vmatprep.mubr.f32.mxu1 %v594_v17 }
 0x100   : > { %1196 = vmatmul.mubr.f32.vlgmr.msra.gmra.mrb[0].mxu1 %v595_v18  ;;  %v597_v24 = vmax.f32 %v475_v19, 0.0 }
 0x101   : > { %v596_v22 = vmax.f32 %v470_v21, 0.0  ;;  %v1123_v23 = vpop.f32.mrb[10].mxu0 }
 0x102   : > { %v485_v25 = vadd.f32 %v1123_v23, %v1592_v57  ;;  %v479_v26 = vpop.f32.mrb[11].mxu0 }
 0x103   : > { %v480_v27 = vadd.f32 %v1592_v57, %v479_v26  ;;  %1198 = vmatprep.mubr.f32.mxu1 %v596_v22 }
 0x104   : > { %1199 = vmatmul.mubr.f32.gmra.mrb[2].mxu1 %v597_v24  ;;  %v599_v30 = vmax.f32 %v485_v25, 0.0 }
 0x105   : > { %v598_v28 = vmax.f32 %v480_v27, 0.0  ;;  %v1126_v29 = vpop.f32.mrb[12].mxu0  ;;  %v1632_v27 = vld [vmem:[%s1756_s4] ss:$0 sm:$0xff] }
 0x106   : > { %v495_v31 = vadd.f32 %v1126_v29, %v1592_v57  ;;  %v489_v32 = vpop.f32.mrb[13].mxu0 }
 0x107   : > { %v490_v33 = vadd.f32 %v1592_v57, %v489_v32  ;;  %1201 = vmatprep.mubr.f32.mxu1 %v598_v28 }
 0x108   : > { %1202 = vmatmul.mubr.f32.gmra.mrb[4].mxu1 %v599_v30  ;;  %v601_v36 = vmax.f32 %v495_v31, 0.0 }
 0x109   : > { %v600_v34 = vmax.f32 %v490_v33, 0.0  ;;  %v1129_v35 = vpop.f32.mrb[14].mxu0 }
 0x10a   : > { %v505_v37 = vadd.f32 %v1129_v35, %v1592_v57  ;;  %v499_v38 = vpop.f32.mrb[15].mxu0 }
 0x10b   : > { %v500_v39 = vadd.f32 %v1592_v57, %v499_v38  ;;  %1204 = vmatprep.mubr.f32.mxu1 %v600_v34 }
 0x10c   : > { %1205 = vmatmul.mubr.f32.gmra.mrb[6].mxu1 %v601_v36  ;;  %v603_v42 = vmax.f32 %v505_v37, 0.0 }
 0x10d   : > { %v602_v40 = vmax.f32 %v500_v39, 0.0  ;;  %v1132_v41 = vpop.f32.mrb[16].mxu0 }
 0x10e   : > { %v515_v43 = vadd.f32 %v1132_v41, %v1592_v57  ;;  %v509_v44 = vpop.f32.mrb[17].mxu0 }
 0x10f   : > { %v510_v45 = vadd.f32 %v1592_v57, %v509_v44  ;;  %1207 = vmatprep.mubr.f32.mxu1 %v602_v40 }
 0x110   : > { %1208 = vmatmul.mubr.f32.gmra.mrb[8].mxu1 %v603_v42  ;;  %v605_v48 = vmax.f32 %v515_v43, 0.0 }
 0x111   : > { %v604_v46 = vmax.f32 %v510_v45, 0.0  ;;  %v1135_v47 = vpop.f32.mrb[18].mxu0 }
 0x112   : > { %v525_v49 = vadd.f32 %v1135_v47, %v1592_v57  ;;  %v519_v50 = vpop.f32.mrb[19].mxu0 }
 0x113   : > { %v520_v51 = vadd.f32 %v1592_v57, %v519_v50  ;;  %1210 = vmatprep.mubr.f32.mxu1 %v604_v46 }
 0x114   : > { %1211 = vmatmul.mubr.f32.gmra.mrb[10].mxu1 %v605_v48  ;;  %v607_v54 = vmax.f32 %v525_v49, 0.0 }
 0x115   : > { %v606_v52 = vmax.f32 %v520_v51, 0.0  ;;  %v1138_v53 = vpop.f32.mrb[20].mxu0 }
 0x116   : > { %v535_v55 = vadd.f32 %v1138_v53, %v1592_v57  ;;  %v529_v56 = vpop.f32.mrb[21].mxu0 }
 0x117   : > { %v530_v58 = vadd.f32 %v1592_v57, %v529_v56  ;;  %1213 = vmatprep.mubr.f32.mxu1 %v606_v52 }
 0x118   : > { %1214 = vmatmul.mubr.f32.gmra.mrb[12].mxu1 %v607_v54  ;;  %v609_v61 = vmax.f32 %v535_v55, 0.0 }
 0x119   : > { %v608_v59 = vmax.f32 %v530_v58, 0.0  ;;  %v1141_v60 = vpop.f32.mrb[22].mxu0 }
 0x11a   : > { %v545_v62 = vadd.f32 %v1141_v60, %v1592_v57  ;;  %v539_v63 = vpop.f32.mrb[23].mxu0 }
 0x11b   : > { %v540_v0 = vadd.f32 %v1592_v57, %v539_v63  ;;  %1216 = vmatprep.mubr.f32.mxu1 %v608_v59 }
 0x11c   : > { %1217 = vmatmul.mubr.f32.gmra.mrb[14].mxu1 %v609_v61  ;;  %v611_v3 = vmax.f32 %v545_v62, 0.0 }
 0x11d   : > { %v610_v1 = vmax.f32 %v540_v0, 0.0  ;;  %v1144_v2 = vpop.f32.mrb[24].mxu0 }
 0x11e   : > { %v555_v4 = vadd.f32 %v1144_v2, %v1592_v57  ;;  %v549_v5 = vpop.f32.mrb[25].mxu0 }
 0x11f   : > { %v550_v6 = vadd.f32 %v1592_v57, %v549_v5  ;;  %1219 = vmatprep.mubr.f32.mxu1 %v610_v1 }
 0x120   : > { %1220 = vmatmul.mubr.f32.gmra.mrb[16].mxu1 %v611_v3  ;;  %v613_v9 = vmax.f32 %v555_v4, 0.0 }
 0x121   : > { %v612_v7 = vmax.f32 %v550_v6, 0.0  ;;  %v1147_v8 = vpop.f32.mrb[26].mxu0 }
 0x122   : > { %v565_v10 = vadd.f32 %v1147_v8, %v1592_v57  ;;  %v559_v11 = vpop.f32.mrb[27].mxu0 }
 0x123   : > { %v560_v12 = vadd.f32 %v1592_v57, %v559_v11  ;;  %1222 = vmatprep.mubr.f32.mxu1 %v612_v7 }
 0x124   : > { %1223 = vmatmul.mubr.f32.gmra.mrb[18].mxu1 %v613_v9  ;;  %v615_v15 = vmax.f32 %v565_v10, 0.0 }
 0x125   : > { %v614_v13 = vmax.f32 %v560_v12, 0.0  ;;  %v1150_v14 = vpop.f32.mrb[28].mxu0 }
 0x126   : > { %v575_v16 = vadd.f32 %v1150_v14, %v1592_v57  ;;  %v569_v17 = vpop.f32.mrb[29].mxu0 }
 0x127   : > { %v570_v18 = vadd.f32 %v1592_v57, %v569_v17  ;;  %1225 = vmatprep.mubr.f32.mxu1 %v614_v13 }
 0x128   : > { %1226 = vmatmul.mubr.f32.gmra.mrb[20].mxu1 %v615_v15  ;;  %v617_v21 = vmax.f32 %v575_v16, 0.0 }
 0x129   : > { %v616_v19 = vmax.f32 %v570_v18, 0.0  ;;  %v1153_v20 = vpop.f32.mrb[30].mxu0 }
 0x12a   : > { %v585_v22 = vadd.f32 %v1153_v20, %v1592_v57  ;;  %v579_v23 = vpop.f32.mrb[31].mxu0 }
 0x12b   : > { %v580_v24 = vadd.f32 %v1592_v57, %v579_v23  ;;  %1228 = vmatprep.mubr.f32.mxu1 %v616_v19 }
 0x12c   : > { %1229 = vmatmul.mubr.f32.gmra.mrb[22].mxu1 %v617_v21  ;;  %v619_v26 = vmax.f32 %v585_v22, 0.0 }
 0x12d   : > { %v618_v25 = vmax.f32 %v580_v24, 0.0 }
 0x12f   : > { %1231 = vmatprep.mubr.f32.mxu1 %v618_v25 }
 0x130   : > { %1232 = vmatmul.mubr.f32.gmra.mrb[24].mxu1 %v619_v26 }
 0x1c7   : > { %v1188_v28 = vpop.f32.mrb[32].mxu0 }
 0x1c8   : > { %v715_v29 = vadd.f32 %v1188_v28, %v1632_v27  ;;  %v709_v30 = vpop.f32.mrb[33].mxu0 }
 0x1c9   : > { %v710_v57 = vadd.f32 %v1632_v27, %v709_v30 }
 0x1ca   : > { %869 = vst [vmem:[%s1636_s23 + $0x8] sm:$0xff] %v715_v29 }
 0x1cb   : > { %868 = vst [vmem:[%s1636_s23] sm:$0xff] %v710_v57  ;;  %v1191_v31 = vpop.f32.mrb[34].mxu0 }
 0x1cc   : > { %v725_v32 = vadd.f32 %v1191_v31, %v1632_v27  ;;  %v719_v33 = vpop.f32.mrb[35].mxu0 }
 0x1cd   : > { %v720_v34 = vadd.f32 %v1632_v27, %v719_v33 }
 0x1ce   : > { %871 = vst [vmem:[%s1636_s23 + $0x18] sm:$0xff] %v725_v32 }
 0x1cf   : > { %870 = vst [vmem:[%s1636_s23 + $0x10] sm:$0xff] %v720_v34  ;;  %v1194_v35 = vpop.f32.mrb[36].mxu0 }
 0x1d0   : > { %v735_v36 = vadd.f32 %v1194_v35, %v1632_v27  ;;  %v729_v37 = vpop.f32.mrb[37].mxu0 }
 0x1d1   : > { %v730_v38 = vadd.f32 %v1632_v27, %v729_v37 }
 0x1d2   : > { %873 = vst [vmem:[%s1636_s23 + $0x28] sm:$0xff] %v735_v36 }
 0x1d3   : > { %872 = vst [vmem:[%s1636_s23 + $0x20] sm:$0xff] %v730_v38  ;;  %v1197_v39 = vpop.f32.mrb[0].mxu1 }
 0x1d4   : > { %v745_v40 = vadd.f32 %v1197_v39, %v1632_v27  ;;  %v739_v41 = vpop.f32.mrb[1].mxu1 }
 0x1d5   : > { %v740_v42 = vadd.f32 %v1632_v27, %v739_v41 }
 0x1d6   : > { %875 = vst [vmem:[%s1636_s23 + $0x38] sm:$0xff] %v745_v40 }
 0x1d7   : > { %874 = vst [vmem:[%s1636_s23 + $0x30] sm:$0xff] %v740_v42  ;;  %v1200_v43 = vpop.f32.mrb[2].mxu1 }
 0x1d8   : > { %v755_v44 = vadd.f32 %v1200_v43, %v1632_v27  ;;  %v749_v45 = vpop.f32.mrb[3].mxu1 }
 0x1d9   : > { %v750_v46 = vadd.f32 %v1632_v27, %v749_v45 }
 0x1da   : > { %877 = vst [vmem:[%s1636_s23 + $0x48] sm:$0xff] %v755_v44 }
 0x1db   : > { %876 = vst [vmem:[%s1636_s23 + $0x40] sm:$0xff] %v750_v46  ;;  %v1203_v47 = vpop.f32.mrb[4].mxu1 }
 0x1dc   : > { %v765_v48 = vadd.f32 %v1203_v47, %v1632_v27  ;;  %v759_v49 = vpop.f32.mrb[5].mxu1 }
 0x1dd   : > { %v760_v50 = vadd.f32 %v1632_v27, %v759_v49 }
 0x1de   : > { %879 = vst [vmem:[%s1636_s23 + $0x58] sm:$0xff] %v765_v48 }
 0x1df   : > { %878 = vst [vmem:[%s1636_s23 + $0x50] sm:$0xff] %v760_v50  ;;  %v1206_v51 = vpop.f32.mrb[6].mxu1 }
 0x1e0   : > { %v775_v52 = vadd.f32 %v1206_v51, %v1632_v27  ;;  %v769_v53 = vpop.f32.mrb[7].mxu1 }
 0x1e1   : > { %v770_v54 = vadd.f32 %v1632_v27, %v769_v53 }
 0x1e2   : > { %881 = vst [vmem:[%s1636_s23 + $0x68] sm:$0xff] %v775_v52 }
 0x1e3   : > { %880 = vst [vmem:[%s1636_s23 + $0x60] sm:$0xff] %v770_v54  ;;  %v1209_v55 = vpop.f32.mrb[8].mxu1 }
 0x1e4   : > { %v785_v56 = vadd.f32 %v1209_v55, %v1632_v27  ;;  %v779_v58 = vpop.f32.mrb[9].mxu1 }
 0x1e5   : > { %v780_v59 = vadd.f32 %v1632_v27, %v779_v58 }
 0x1e6   : > { %883 = vst [vmem:[%s1636_s23 + $0x78] sm:$0xff] %v785_v56 }
 0x1e7   : > { %882 = vst [vmem:[%s1636_s23 + $0x70] sm:$0xff] %v780_v59  ;;  %v1212_v60 = vpop.f32.mrb[10].mxu1 }
 0x1e8   : > { %v795_v61 = vadd.f32 %v1212_v60, %v1632_v27  ;;  %v789_v62 = vpop.f32.mrb[11].mxu1 }
 0x1e9   : > { %v790_v63 = vadd.f32 %v1632_v27, %v789_v62 }
 0x1ea   : > { %885 = vst [vmem:[%s1636_s23 + $0x88] sm:$0xff] %v795_v61 }
 0x1eb   : > { %884 = vst [vmem:[%s1636_s23 + $0x80] sm:$0xff] %v790_v63  ;;  %v1215_v0 = vpop.f32.mrb[12].mxu1 }
 0x1ec   : > { %v805_v1 = vadd.f32 %v1215_v0, %v1632_v27  ;;  %v799_v2 = vpop.f32.mrb[13].mxu1 }
 0x1ed   : > { %v800_v3 = vadd.f32 %v1632_v27, %v799_v2 }
 0x1ee   : > { %887 = vst [vmem:[%s1636_s23 + $0x98] sm:$0xff] %v805_v1 }
 0x1ef   : > { %886 = vst [vmem:[%s1636_s23 + $0x90] sm:$0xff] %v800_v3  ;;  %v1218_v4 = vpop.f32.mrb[14].mxu1 }
 0x1f0   : > { %v815_v5 = vadd.f32 %v1218_v4, %v1632_v27  ;;  %v809_v6 = vpop.f32.mrb[15].mxu1 }
 0x1f1   : > { %v810_v7 = vadd.f32 %v1632_v27, %v809_v6 }
 0x1f2   : > { %889 = vst [vmem:[%s1636_s23 + $0xa8] sm:$0xff] %v815_v5 }
 0x1f3   : > { %888 = vst [vmem:[%s1636_s23 + $0xa0] sm:$0xff] %v810_v7  ;;  %v1221_v8 = vpop.f32.mrb[16].mxu1 }
 0x1f4   : > { %v825_v9 = vadd.f32 %v1221_v8, %v1632_v27  ;;  %v819_v10 = vpop.f32.mrb[17].mxu1 }
 0x1f5   : > { %v820_v11 = vadd.f32 %v1632_v27, %v819_v10 }
 0x1f6   : > { %891 = vst [vmem:[%s1636_s23 + $0xb8] sm:$0xff] %v825_v9 }
 0x1f7   : > { %890 = vst [vmem:[%s1636_s23 + $0xb0] sm:$0xff] %v820_v11  ;;  %v1224_v12 = vpop.f32.mrb[18].mxu1 }
 0x1f8   : > { %v835_v13 = vadd.f32 %v1224_v12, %v1632_v27  ;;  %v829_v14 = vpop.f32.mrb[19].mxu1 }
 0x1f9   : > { %v830_v15 = vadd.f32 %v1632_v27, %v829_v14 }
 0x1fa   : > { %893 = vst [vmem:[%s1636_s23 + $0xc8] sm:$0xff] %v835_v13 }
 0x1fb   : > { %892 = vst [vmem:[%s1636_s23 + $0xc0] sm:$0xff] %v830_v15  ;;  %v1227_v16 = vpop.f32.mrb[20].mxu1 }
 0x1fc   : > { %v845_v17 = vadd.f32 %v1227_v16, %v1632_v27  ;;  %v839_v18 = vpop.f32.mrb[21].mxu1 }
 0x1fd   : > { %v840_v19 = vadd.f32 %v1632_v27, %v839_v18 }
 0x1fe   : > { %895 = vst [vmem:[%s1636_s23 + $0xd8] sm:$0xff] %v845_v17 }
 0x1ff   : > { %894 = vst [vmem:[%s1636_s23 + $0xd0] sm:$0xff] %v840_v19  ;;  %v1230_v20 = vpop.f32.mrb[22].mxu1 }
 0x200   : > { %v855_v21 = vadd.f32 %v1230_v20, %v1632_v27  ;;  %v849_v22 = vpop.f32.mrb[23].mxu1 }
 0x201   : > { %v850_v23 = vadd.f32 %v1632_v27, %v849_v22 }
 0x202   : > { %897 = vst [vmem:[%s1636_s23 + $0xe8] sm:$0xff] %v855_v21 }
 0x203   : > { %896 = vst [vmem:[%s1636_s23 + $0xe0] sm:$0xff] %v850_v23  ;;  %v1233_v24 = vpop.f32.mrb[24].mxu1 }
 0x204   : > { %v865_v25 = vadd.f32 %v1233_v24, %v1632_v27  ;;  %v859_v26 = vpop.f32.mrb[25].mxu1 }
 0x205   : > { %v860_v28 = vadd.f32 %v1632_v27, %v859_v26 }
 0x206   : > { %899 = vst [vmem:[%s1636_s23 + $0xf8] sm:$0xff] %v865_v25 }
 0x207   : > { %898 = vst [vmem:[%s1636_s23 + $0xf0] sm:$0xff] %v860_v28 }
 0x208   : > { %1336 = shalt.err (!%p1333_p3)
}
 0x209   : > { %s1337_s13 = scalar_lea.hbm %s1702_s9, 4096  ;;  %s1341_s15 = scalar_lea.hbm %s1757_s5, 8192 }
 0x20a   : > { %p1338_p4 = scmp.ne.s32.totalorder %s1702_s9, %s1337_s13  ;;  %p1342_p9 = scmp.lt.u32.totalorder %s1702_s9, %s1757_s5 }
 0x20b   : > { %p1343_p10 = scmp.lt.u32.totalorder %s1341_s15, %s1337_s13  ;;  %p1345_p12 = scmp.lt.u32.totalorder %s1337_s13, %s1702_s9 }
 0x20c   : > { %p1339_p7 = pnand %p1338_p4, %p1458_p5 }
 0x20d   : > { %p1344_p11 = por %p1343_p10, %p1342_p9 }
 0x20e   : > { %p1340_p8 = pneg %p1339_p7 }
 0x20f   : > { %p1346_p13 = por %p1345_p12, %p1344_p11 }
 0x211   : > { %p1347_p0 = pnand %p1346_p13, %p1340_p8 }
 0x213   : > { %1350 = shalt.err (!%p1347_p0)
}
 0x214   : > { %s1388_s23 = smov 128   ;;  %s1389_s25 = smov 8  }
 0x215   : > { %1282 = dma.vmem_to_hbm [thread:$0]  (%p1458_p5), %s1704_s26, 4096, %s1702_s9, %s1711_s22, %s1388_s23, %s1388_s23, %s1389_s25  }
 0x216 PF: > { %p1288_p1 = scmp.ge.s32.totalorder %s1385_s21, 2  ;;  %s929_s30 = sand.u32 1, %s1373_s18  }
 0x217   : > { %s930_s6 = scalar_lea.sflag [#allocation3], %s929_s30 }
 0x218   : > { %p1285_p2 = pnand %p1288_p1, %p1462_p6 }
 0x21a   : > { %1368 = dma.done.wait (!%p1285_p2), %s930_s6, 4096  }
 0x21b   : > { %1370 = vsyncadd (!%p1285_p2), %s930_s6, 4294963200  ;;  %p15_p3 = scmp.ge.s32.totalorder %s1445_s24, 4   ;;  %s1760_s18 = smov %s1377_s19 }
 0x21c   : > { %s1761_s19 = smov %s1381_s20  ;;  %s1762_s20 = smov %s1456_s27 }
 0x21d   : > { %s1763_s21 = smov %s1445_s24  ;;  %17 = sbr.rel (!%p15_p3) target bundleno = 3 (0x3), region = 75 }
 0x224   :  { %935 = vsyncpa [#allocation3], 1 }
 0x225   :  { %937 = vsyncpa [#allocation3 + $0x1], 1 }

</bundles_post_ra>
